<compile_context>
chip_gen: v7x
topology: tpu7x:2x2x1
jax: 0.10.0
libtpu: 0.0.40
codegen_flags: <defaults>
</compile_context>

<pallas_src>
import functools

import jax
import jax.numpy as jnp
from jax.experimental import pallas as pl
from jax.experimental.pallas import tpu as pltpu


# -----------------------------------------------------------------------------
# Pallas kernel: fused linear projection (ctc_lo) + log_softmax over odim
# -----------------------------------------------------------------------------
def _ctc_lo_logsoftmax_kernel(x_ref, w_ref, b_ref, o_ref):
    # x_ref: (tm, E) bf16   w_ref: (E, odim_pad) bf16
    # b_ref: (1, odim_pad) f32   o_ref: (tm, odim_pad) f32
    x = x_ref[...]
    w = w_ref[...]
    logits = jnp.dot(x, w, preferred_element_type=jnp.float32) + b_ref[...]
    m = jnp.max(logits, axis=-1, keepdims=True)
    z = logits - m
    lse = jnp.log(jnp.sum(jnp.exp(z), axis=-1, keepdims=True))
    o_ref[...] = (z - lse).astype(o_ref.dtype)


def _round_up(x, m):
    return ((x + m - 1) // m) * m


def ctc_lo_log_softmax(hs_pad, weight_t, bias, *, tm_max=512):
    """Fused ctc_lo linear + log_softmax.

    hs_pad:   (B, T, E) float32
    weight_t: (E, odim) float32  (torch Linear weight transposed)
    bias:     (odim,)   float32
    returns:  (B, T, odim) float32 log-probabilities
    """
    B, T, E = hs_pad.shape
    odim = weight_t.shape[1]
    rows = B * T

    odim_pad = _round_up(odim, 128)

    # Row tile: as large as possible for MXU M-utilization and to keep the
    # number of (0.35us-overhead) grid steps small, but bounded by a VMEM
    # budget that is safe on v7x (64 MiB physical VMEM).
    def _vmem_est(tm_):
        return (2 * tm_ * E * 2            # x bf16, double-buffered
                + 2 * tm_ * odim_pad * 4   # out f32, double-buffered
                + 2 * E * odim_pad * 2     # weight bf16
                + 2 * odim_pad * 4         # bias f32
                + 3 * tm_ * odim_pad * 4)  # in-kernel f32 temporaries

    budget = 40 * 1024 * 1024
    tm = max(8, min(tm_max, _round_up(rows, 8)))
    while tm > 8 and _vmem_est(tm) > budget:
        tm = max(8, (tm // 2 // 8) * 8)

    rows_pad = _round_up(rows, tm)
    grid = rows_pad // tm

    # Prepare padded / bf16 operands.
    x2d = hs_pad.reshape(rows, E).astype(jnp.bfloat16)
    if rows_pad != rows:
        x2d = jnp.pad(x2d, ((0, rows_pad - rows), (0, 0)))
    w = weight_t.astype(jnp.bfloat16)
    b = bias.astype(jnp.float32)
    if odim_pad != odim:
        w = jnp.pad(w, ((0, 0), (0, odim_pad - odim)))
        # padded logits = -1e30 so max / logsumexp over lanes are unaffected
        b = jnp.pad(b, (0, odim_pad - odim), constant_values=-1e30)
    b2d = b.reshape(1, odim_pad)

    vmem_limit = int(min(64 * 1024 * 1024,
                         max(_vmem_est(tm) + (4 << 20), 16 << 20)))

    out = pl.pallas_call(
        _ctc_lo_logsoftmax_kernel,
        out_shape=jax.ShapeDtypeStruct((rows_pad, odim_pad), jnp.float32),
        grid_spec=pltpu.PrefetchScalarGridSpec(
            num_scalar_prefetch=0,
            grid=(grid,),
            in_specs=[
                pl.BlockSpec((tm, E), lambda i: (i, 0)),
                pl.BlockSpec((E, odim_pad), lambda i: (0, 0)),
                pl.BlockSpec((1, odim_pad), lambda i: (0, 0)),
            ],
            out_specs=pl.BlockSpec((tm, odim_pad), lambda i: (i, 0)),
        ),
        compiler_params=pltpu.CompilerParams(
            dimension_semantics=("parallel",),
            vmem_limit_bytes=vmem_limit),
    )(x2d, w, b2d)

    out = out[:rows, :odim]
    return out.reshape(B, T, odim)


# -----------------------------------------------------------------------------
# CTC loss (builtin-style: log_softmax'd preds, reduction='sum', / batch)
# TODO(synk): the CTC alpha recursion is a sequential, data-dependent DP with
#             tiny per-step width (2*Lmax+1); no clean Pallas equivalent, kept
#             as a plain-JAX lax.scan over the small gathered (T, B, S) tensor.
# -----------------------------------------------------------------------------
def ctc_loss_forward(log_probs_btc, targets_pad, input_lengths, target_lengths,
                     blank=0):
    """Forward (negative log-likelihood) CTC loss per batch element.

    log_probs_btc:  (B, T, C) float32, already log-softmaxed
    targets_pad:    (B, Lmax) int32, padded with -1
    input_lengths:  (B,) int32
    target_lengths: (B,) int32
    returns: per-batch losses (B,) float32
    """
    B, T, C = log_probs_btc.shape
    Lmax = targets_pad.shape[1]
    S = 2 * Lmax + 1
    neg_inf = jnp.float32(-1e30)

    ext = jnp.full((B, S), blank, dtype=jnp.int32)
    ext = ext.at[:, 1::2].set(targets_pad.astype(jnp.int32))
    ext_safe = jnp.where(ext < 0, blank, ext)                    # (B, S)
    S_len = 2 * target_lengths.astype(jnp.int32) + 1             # (B,)
    input_lengths = input_lengths.astype(jnp.int32)

    # Gather emission log-probs onto the extended label sequence in (B,T,C)
    # layout, then transpose only the small (B,T,S) tensor -> (T,B,S).
    idx = jnp.broadcast_to(ext_safe[:, None, :], (B, T, S))
    lp_ext_bts = jnp.take_along_axis(log_probs_btc, idx, axis=2)  # (B, T, S)
    lp_ext = jnp.transpose(lp_ext_bts, (1, 0, 2))                 # (T, B, S)

    # skip-transition (s-2) allowed iff ext[s] != blank and ext[s] != ext[s-2]
    ext_sm2 = jnp.concatenate(
        [jnp.full((B, 2), -2, jnp.int32), ext_safe[:, :-2]], axis=1)
    allow_skip = (ext_safe != blank) & (ext_safe != ext_sm2)      # (B, S)

    s_idx = jnp.arange(S)[None, :]
    alpha0 = jnp.where(s_idx == 0, lp_ext[0], neg_inf)
    alpha0 = jnp.where((s_idx == 1) & (target_lengths[:, None] > 0),
                       lp_ext[0], alpha0)

    def step(alpha_prev, inputs):
        lp_t, t = inputs                                          # (B,S), ()
        a1 = jnp.concatenate(
            [jnp.full((B, 1), neg_inf), alpha_prev[:, :-1]], axis=1)
        a2 = jnp.concatenate(
            [jnp.full((B, 2), neg_inf), alpha_prev[:, :-2]], axis=1)
        a2 = jnp.where(allow_skip, a2, neg_inf)
        combined = jnp.logaddexp(jnp.logaddexp(alpha_prev, a1), a2)
        alpha_new = combined + lp_t
        valid = (t < input_lengths)[:, None]
        alpha_new = jnp.where(valid, alpha_new, alpha_prev)
        return alpha_new, None

    ts = jnp.arange(1, T)
    alpha_final, _ = jax.lax.scan(step, alpha0, (lp_ext[1:], ts))

    idx_last = jnp.clip(S_len - 1, 0, S - 1)
    idx_prev = jnp.clip(S_len - 2, 0, S - 1)
    a_last = jnp.take_along_axis(alpha_final, idx_last[:, None], axis=1)[:, 0]
    a_prev = jnp.take_along_axis(alpha_final, idx_prev[:, None], axis=1)[:, 0]
    # zero-length targets: only the single blank state contributes
    a_prev = jnp.where(S_len >= 2, a_prev, neg_inf)
    return -jnp.logaddexp(a_last, a_prev)                         # (B,)


# -----------------------------------------------------------------------------
# CTC "module" forward, mirroring the PyTorch class (ctc_type='builtin',
# reduce=True, dropout_rate=0.0 for determinism).
# -----------------------------------------------------------------------------
@functools.partial(jax.jit, static_argnames=())
def ctc_forward(hs_pad, hlens, ys_pad, weight_t, bias):
    """Returns scalar CTC loss (builtin path: CTCLoss(reduction='sum') / B)."""
    # dropout_rate = 0.0  -> F.dropout is identity
    # ctc_lo + log_softmax fused in the Pallas kernel (the builtin loss_fn
    # applies log_softmax to ys_hat before CTCLoss, so we fuse it here).
    log_probs_btc = ctc_lo_log_softmax(hs_pad, weight_t, bias)    # (B, T, C)

    olens = jnp.sum(ys_pad != -1, axis=1).astype(jnp.int32)       # (B,)
    loss_b = ctc_loss_forward(log_probs_btc, ys_pad,
                              hlens.astype(jnp.int32), olens)
    B = hs_pad.shape[0]
    # torch.nn.CTCLoss(reduction='sum') then / th_pred.size(1) == / B
    return jnp.sum(loss_b) / B


if __name__ == "__main__":
    # Small deterministic example: B=2, T=8, eprojs=32, odim=16, Lmax=4
    B, T, E, odim, Lmax = 2, 8, 32, 16, 4

    key = jax.random.PRNGKey(0)
    k_x, k_w, k_b, k_y = jax.random.split(key, 4)

    hs_pad = jax.random.normal(k_x, (B, T, E), dtype=jnp.float32)
    # torch Linear weight is (odim, eprojs); we store its transpose (E, odim)
    weight_t = (jax.random.normal(k_w, (E, odim), dtype=jnp.float32)
                * (1.0 / jnp.sqrt(E)))
    bias = jax.random.normal(k_b, (odim,), dtype=jnp.float32) * 0.01

    hlens = jnp.array([8, 6], dtype=jnp.int32)
    # targets in [1, odim-1] (0 is blank), padded with -1
    y0 = jax.random.randint(k_y, (Lmax,), 1, odim, dtype=jnp.int32)
    ys_pad = jnp.stack([
        y0,
        jnp.concatenate([y0[:3] % (odim - 1) + 1,
                         jnp.array([-1], dtype=jnp.int32)]),
    ])  # lengths 4 and 3

    loss = ctc_forward(hs_pad, hlens, ys_pad, weight_t, bias)
    loss = jax.block_until_ready(loss)

    # sanity: finite scalar, and kernel matches a plain-JAX reference computed
    # with the same bf16-rounded inputs (kernel casts x / W to bf16 for MXU).
    xb = hs_pad.astype(jnp.bfloat16).astype(jnp.float32)
    wb = weight_t.astype(jnp.bfloat16).astype(jnp.float32)
    ref_lp = jax.nn.log_softmax(xb @ wb + bias, axis=-1)
    kern_lp = ctc_lo_log_softmax(hs_pad, weight_t, bias)
    kern_lp = jax.block_until_ready(kern_lp)

    assert bool(jnp.isfinite(loss)), "CTC loss is not finite"
    assert jnp.allclose(kern_lp, ref_lp, atol=2e-3, rtol=2e-3), \
        "fused linear+log_softmax kernel mismatch"
    # loose check against the full-f32 reference (bf16 input rounding only)
    ref_lp_f32 = jax.nn.log_softmax(hs_pad @ weight_t + bias, axis=-1)
    assert jnp.allclose(kern_lp, ref_lp_f32, atol=5e-2, rtol=5e-2)

    print("KERNEL_OK")
</pallas_src>

<mosaic_0001>
module attributes {stable_mosaic.version = 11 : i64} {
  func.func @_ctc_lo_logsoftmax_kernel(%arg0: i32, %arg1: memref<16x32xbf16, #tpu.memory_space<vmem>>, %arg2: memref<32x128xbf16, #tpu.memory_space<vmem>>, %arg3: memref<1x128xf32, #tpu.memory_space<vmem>>, %arg4: memref<16x128xf32, #tpu.memory_space<vmem>>) attributes {dimension_semantics = [#tpu.dimension_semantics<parallel>], iteration_bounds = array<i64: 1>, scalar_prefetch = 0 : i64, scratch_operands = 0 : i64, tpu.core_type = #tpu.core_type<tc>, window_params = [{transform_indices = @transform_0, window_bounds = array<i64: 16, 32>}, {pipeline_mode = #tpu.pipeline_mode<synchronous>, transform_indices = @transform_1, window_bounds = array<i64: 32, 128>}, {pipeline_mode = #tpu.pipeline_mode<synchronous>, transform_indices = @transform_2, window_bounds = array<i64: 1, 128>}, {transform_indices = @transform_3, window_bounds = array<i64: 16, 128>}]} {
    %c0 = arith.constant 0 : index
    %c0_0 = arith.constant 0 : index
    %0 = vector.load %arg1[%c0, %c0_0] : memref<16x32xbf16, #tpu.memory_space<vmem>>, vector<16x32xbf16>
    %c0_1 = arith.constant 0 : index
    %c0_2 = arith.constant 0 : index
    %1 = vector.load %arg2[%c0_1, %c0_2] : memref<32x128xbf16, #tpu.memory_space<vmem>>, vector<32x128xbf16>
    %cst = arith.constant dense<0.000000e+00> : vector<16x128xf32>
    %2 = tpu.matmul %0, %1, %cst {dimension_numbers = #tpu.dot_dimension_numbers<[1], [0], [0], [1], [0, 0, 1, 1], [], []>} : vector<16x32xbf16>, vector<32x128xbf16>, vector<16x128xf32> -> vector<16x128xf32>
    %c0_3 = arith.constant 0 : index
    %c0_4 = arith.constant 0 : index
    %3 = vector.load %arg3[%c0_3, %c0_4] : memref<1x128xf32, #tpu.memory_space<vmem>>, vector<1x128xf32>
    %4 = vector.broadcast %3 : vector<1x128xf32> to vector<16x128xf32>
    %5 = arith.addf %2, %4 : vector<16x128xf32>
    %cst_5 = arith.constant dense<0xFF800000> : vector<16xf32>
    %6 = vector.multi_reduction <maximumf>, %5, %cst_5 [1] : vector<16x128xf32> to vector<16xf32>
    %7 = vector.shape_cast %6 : vector<16xf32> to vector<16x1xf32>
    %8 = vector.broadcast %7 : vector<16x1xf32> to vector<16x128xf32>
    %9 = arith.subf %5, %8 : vector<16x128xf32>
    %10 = math.exp %9 : vector<16x128xf32>
    %cst_6 = arith.constant dense<0.000000e+00> : vector<16xf32>
    %11 = vector.multi_reduction <add>, %10, %cst_6 [1] : vector<16x128xf32> to vector<16xf32>
    %12 = vector.shape_cast %11 : vector<16xf32> to vector<16x1xf32>
    %13 = math.log %12 : vector<16x1xf32>
    %14 = vector.broadcast %13 : vector<16x1xf32> to vector<16x128xf32>
    %15 = arith.subf %9, %14 : vector<16x128xf32>
    %c0_7 = arith.constant 0 : index
    %c0_8 = arith.constant 0 : index
    %16 = vector.load %arg4[%c0_7, %c0_8] : memref<16x128xf32, #tpu.memory_space<vmem>>, vector<16x128xf32>
    tpu.vector_store %arg4[%c0_7, %c0_8], %15 {strides = array<i32>} : memref<16x128xf32, #tpu.memory_space<vmem>>, vector<16x128xf32>,
    return
  }
  func.func @transform_0(%arg0: i32) -> (i32, i32) {
    %c0_i32 = arith.constant 0 : i32
    %c0_i32_0 = arith.constant 0 : i32
    return %arg0, %c0_i32 : i32, i32
  }
  func.func @transform_1(%arg0: i32) -> (i32, i32) {
    %c0_i32 = arith.constant 0 : i32
    %c0_i32_0 = arith.constant 0 : i32
    %c0_i32_1 = arith.constant 0 : i32
    return %c0_i32, %c0_i32_0 : i32, i32
  }
  func.func @transform_2(%arg0: i32) -> (i32, i32) {
    %c0_i32 = arith.constant 0 : i32
    %c0_i32_0 = arith.constant 0 : i32
    %c0_i32_1 = arith.constant 0 : i32
    return %c0_i32, %c0_i32_0 : i32, i32
  }
  func.func @transform_3(%arg0: i32) -> (i32, i32) {
    %c0_i32 = arith.constant 0 : i32
    %c0_i32_0 = arith.constant 0 : i32
    return %arg0, %c0_i32 : i32, i32
  }
}

</mosaic_0001>

<bundles_post_ra>
// kernel: ctc_forward.1
= control target key start
LH: loop header
LB: loop body
LE: loop exit
PB: predicated region body
PF: predicated region fallthrough
CT: control target
= control target key end

     0   :  { %v145_v0 = vmov 0.0   ;;  %vm146_vm0 = vmmov 0   ;;  %vm45_vm1 = vcmask 261120   ;;  %s185_s1 = inlined_call_operand.vmem [shape: bf16[32,128], index: 1, kind: input, shape index: {}]   ;;  %s186_s0 = inlined_call_operand.vmem [shape: bf16[16,32], index: 0, kind: input, shape index: {}]   ;;  %s187_s2 = inlined_call_operand.vmem [shape: f32[1,128], index: 2, kind: input, shape index: {}]   ;;  %s188_s3 = inlined_call_operand.vmem [shape: f32[16,128], index: 3, kind: output, shape index: {}]  }
   0x1   :  { %124 = vmatprep.subr.bf16.mxu0 %v145_v0  ;;  %v134_v1 = vld [vmem:[%s185_s1] sm:$0xff]   ;;  %128 = vmatprep.mubr.msk.bf16.mxu0 %vm146_vm0, %v145_v0  ;;  %v135_v2 = vld [vmem:[%s185_s1 + $0x8] sm:$0xff]  }
   0x2   :  { %125 = vmatpush3.bf16.msra.mxu0 %v134_v1  ;;  %v136_v3 = vld [vmem:[%s186_s0] sm:$0xff]  }
   0x3   :  { %126 = vmatprep.subr.bf16.mxu0 %v145_v0  ;;  %v116_v4 = vld [vmem:[%s187_s2] ss:$0 sm:$0xff] }
   0x6   :  { %127 = vmatpush3.bf16.msra.mxu0 %v135_v2 }
   0x9   :  { %129 = vmatmul.mubr.msk.bf16.vlgmr.msra.gmra.mrb[0].mxu0 %vm45_vm1, %v136_v3 }
  0xdc   :  { %v83_v5 = vpop.f32.mrb[0].mxu0 }
  0xdd   :  { %v84_v6 = vadd.f32 %v116_v4, %v83_v5  ;;  %v130_v7 = vpop.f32.mrb[1].mxu0 }
  0xde   :  { %v86_v8 = vpop.f32.mrb[2].mxu0 }
  0xdf   :  { %90 = vmax.xlane.f32.xlu0 %v84_v6  ;;  %v131_v9 = vpop.f32.mrb[3].mxu0  ;;  %v87_v10 = vadd.f32 %v116_v4, %v86_v8 }
  0xe3   :  { %92 = vmax.xlane.f32.xlu0 %v87_v10 }
 0x16c   :  { %v91_v11 = vpop.xlane.xlu0 %90 }
 0x16d   :  { %v94_v12 = vsub.f32 %v84_v6, %v91_v11 }
 0x16f   :  { %v96_v13 = vmul.f32 1.442695, %v94_v12 }
 0x170   :  { %v93_v14 = vpop.xlane.xlu0 %92 }
 0x171   :  { %v95_v15 = vsub.f32 %v87_v10, %v93_v14  ;;  %137 = vpow2.f32 %v96_v13 }
 0x173   :  { %v98_v16 = vmul.f32 1.442695, %v95_v15 }
 0x175   :  { %139 = vpow2.f32 %v98_v16 }
 0x17b   :  { %v138_v17 = vpop.eup %137 }
 0x17c   :  { %100 = vadd.xlane.f32.xlu1 %v138_v17 }
 0x17f   :  { %v140_v18 = vpop.eup %139 }
 0x180   :  { %102 = vadd.xlane.f32.xlu1 %v140_v18 }
 0x209   :  { %v101_v19 = vpop.xlane.xlu1 %100 }
 0x20a   :  { %141 = vlog2.f32 %v101_v19 }
 0x20d   :  { %v103_v20 = vpop.xlane.xlu1 %102 }
 0x20e   :  { %143 = vlog2.f32 %v103_v20 }
 0x214   :  { %v142_v21 = vpop.eup %141 }
 0x215   :  { %v105_v22 = vmul.f32 0.6931472, %v142_v21 }
 0x217   :  { %v108_v23 = vsub.f32 %v94_v12, %v105_v22 }
 0x218   :  { %v144_v24 = vpop.eup %143 }
 0x219   :  { %110 = vst [vmem:[%s188_s3] sm:$0xff] %v108_v23  ;;  %v107_v25 = vmul.f32 0.6931472, %v144_v24 }
 0x21b   :  { %v109_v26 = vsub.f32 %v95_v15, %v107_v25 }
 0x21d   :  { %111 = vst [vmem:[%s188_s3 + $0x8] sm:$0xff] %v109_v26 }

</bundles_post_ra>
